<compile_context>
chip_gen: v5e
topology: v5e:2x2
jax: 0.10.0
libtpu: 0.0.40
codegen_flags: <defaults>
</compile_context>

<pallas_src>
import jax
import jax.numpy as jnp
from jax import lax
from jax.experimental import pallas as pl
from jax.experimental.pallas import tpu as pltpu


def _choose_k_tile(chw, target=2048):
    """K tile: full extent if it fits the target, else the largest 128-multiple
    divisor of CHW <= target (falls back to a single full-extent tile)."""
    if chw <= target:
        return chw
    tk = (target // 128) * 128
    while tk >= 128:
        if chw % tk == 0:
            return tk
        tk -= 128
    return chw


def _kernel(x_ref,        # VMEM [B, tk]   f32   centered activations, K tile
            wm_ref,       # VMEM [tk, D]   bf16  model-linear weight, K tile
            bm_ref,       # VMEM [1, D]    f32   model-linear bias
            wc_ref,       # VMEM [NC, D]   f32   classifier weight (un-normalized)
            lbl_ref,      # VMEM [B, 1]    int32 labels
            loss_ref,     # VMEM [1, 1]    f32
            acc_ref,      # VMEM [1, 1]    f32
            emb_acc):     # VMEM scratch [B, D] f32 accumulator
    k = pl.program_id(0)
    nk = pl.num_programs(0)

    @pl.when(k == 0)
    def _init():
        emb_acc[...] = jnp.zeros_like(emb_acc)

    # K-blocked embedding matmul: bf16 MXU operands, f32 accumulation.
    # (The [B, tk] activation cast is tiny; Wm arrives pre-cast from HBM.)
    emb_acc[...] += jnp.dot(x_ref[...].astype(jnp.bfloat16), wm_ref[...],
                            preferred_element_type=jnp.float32)

    @pl.when(k == nk - 1)
    def _epilogue():
        B = emb_acc.shape[0]
        NC = wc_ref.shape[0]

        emb = emb_acc[...] + bm_ref[...]                      # [B, D] f32

        # F.normalize(model.weight): wn = Wc * rsqrt(max(sum(Wc^2), eps^2))
        # (rsqrt -> EUP slot; identical to Wc / max(||Wc||, 1e-12)).
        wc = wc_ref[...]
        sumsq = jnp.sum(wc * wc, axis=1, keepdims=True)
        wn = wc * lax.rsqrt(jnp.maximum(sumsq, 1e-24))

        # logits = emb @ wn.T  (epilogue-tiny; keep f32 for CE/argmax fidelity)
        logit = lax.dot_general(emb, wn, (((1,), (1,)), ((), ())),
                                preferred_element_type=jnp.float32)  # [B, NC]

        col = lax.broadcasted_iota(jnp.int32, (B, NC), 1)
        labels = lbl_ref[...]                                 # [B, 1] int32

        # cross-entropy (mean over batch), logsumexp-stabilized
        row_max = jnp.max(logit, axis=1, keepdims=True)                    # [B, 1]
        lse = row_max + jnp.log(jnp.sum(jnp.exp(logit - row_max),
                                        axis=1, keepdims=True))            # [B, 1]
        target = jnp.sum(jnp.where(col == labels, logit, 0.0),
                         axis=1, keepdims=True)                            # [B, 1]
        loss_ref[...] = jnp.sum(lse - target, axis=0, keepdims=True) * (1.0 / B)

        # top-1 accuracy (first-occurrence argmax, matches jnp.argmax)
        pred = jnp.min(jnp.where(logit == row_max, col, NC),
                       axis=1, keepdims=True)                              # [B, 1]
        correct = (pred == labels).astype(jnp.float32)                     # [B, 1]
        acc_ref[...] = jnp.sum(correct, axis=0, keepdims=True) * (1.0 / B)


def softmax_loss(x, label, Wm, bm, Wc, *, k_tile_target=2048):
    """x: [B,C,H,W] f32; label: [B] int; Wm: [CHW,D]; bm: [1,D]; Wc: [NC,D]."""
    B, C, H, W = x.shape
    CHW = C * H * W
    D = Wm.shape[1]
    NC = Wc.shape[0]

    # Centering at XLA level (fused elementwise over ~B*CHW*4 bytes, negligible
    # next to the Wm stream) -> lane-dense [B, CHW] activations for the kernel.
    feat = (x - jnp.mean(x, axis=3, keepdims=True)).reshape(B, CHW)

    # Dominant HBM stream is Wm: keep D unpadded, feed bf16 (see header note).
    Wm_bf = Wm.astype(jnp.bfloat16)
    bm2 = bm.reshape(1, D).astype(jnp.float32)
    labels = label.reshape(B, 1).astype(jnp.int32)

    tk = _choose_k_tile(CHW, k_tile_target)
    nk = CHW // tk

    wm_kwargs = {}
    if nk >= 4:
        # Deepen buffering of the single dominant stream (cheap in VMEM) rather
        # than shrinking tiles if DMA latency is exposed at large CHW.
        wm_kwargs["pipeline_mode"] = pl.Buffered(3)
    wm_spec = pl.BlockSpec((tk, D), lambda k: (k, 0), **wm_kwargs)

    grid_spec = pltpu.PrefetchScalarGridSpec(
        num_scalar_prefetch=0,
        grid=(nk,),
        in_specs=[
            pl.BlockSpec((B, tk), lambda k: (0, k)),      # centered activations
            wm_spec,                                      # Wm K tile (streamed, bf16)
            pl.BlockSpec((1, D), lambda k: (0, 0)),       # bias
            pl.BlockSpec((NC, D), lambda k: (0, 0)),      # classifier weight
            pl.BlockSpec((B, 1), lambda k: (0, 0)),       # labels
        ],
        out_specs=(
            pl.BlockSpec((1, 1), lambda k: (0, 0)),       # loss
            pl.BlockSpec((1, 1), lambda k: (0, 0)),       # acc
        ),
        scratch_shapes=[pltpu.VMEM((B, D), jnp.float32)], # emb accumulator
    )

    flops = 2 * B * CHW * D + 2 * B * D * NC + 3 * NC * D + 8 * B * NC
    transcendentals = NC + B * NC + B
    bytes_accessed = (2 * CHW * D            # Wm (bf16, unpadded D)
                      + 4 * B * CHW          # activations (f32)
                      + 4 * NC * D + 4 * D   # Wc + bias
                      + 4 * B + 8)           # labels + outputs

    loss, acc = pl.pallas_call(
        _kernel,
        out_shape=(jax.ShapeDtypeStruct((1, 1), jnp.float32),
                   jax.ShapeDtypeStruct((1, 1), jnp.float32)),
        grid_spec=grid_spec,
        compiler_params=pltpu.CompilerParams(
            dimension_semantics=("arbitrary",),   # K is a reduction axis
            vmem_limit_bytes=32 * 1024 * 1024,    # actual use ~1 MiB; safe on v7x
        ),
        cost_estimate=pl.CostEstimate(flops=flops,
                                      transcendentals=transcendentals,
                                      bytes_accessed=bytes_accessed),
    )(feat, Wm_bf, bm2, Wc, labels)

    return loss[0, 0], acc[0, 0]


# --------------------------- Plain-JAX reference ---------------------------
def reference(x, label, Wm, bm, Wc):
    xc = x - jnp.mean(x, axis=3, keepdims=True)
    feat = xc.reshape(x.shape[0], -1)
    emb = feat @ Wm + bm
    wn = Wc / jnp.maximum(
        jnp.sqrt(jnp.sum(Wc * Wc, axis=1, keepdims=True)), 1e-12)
    logit = emb @ wn.T
    lse = jax.scipy.special.logsumexp(logit, axis=1)
    tl = logit[jnp.arange(x.shape[0]), label]
    loss = jnp.mean(lse - tl)
    acc = jnp.mean((jnp.argmax(logit, axis=1) == label).astype(jnp.float32))
    return loss, acc, logit


if __name__ == "__main__":
    B, C, H, W = 2, 4, 16, 16
    D, NC = 32, 10
    CHW = C * H * W

    key = jax.random.PRNGKey(0)
    kx, kl, kwm, kbm, kwc = jax.random.split(key, 5)

    x = jax.random.normal(kx, (B, C, H, W), dtype=jnp.float32)
    label = jax.random.randint(kl, (B,), 0, NC, dtype=jnp.int32)
    Wm = jax.random.normal(kwm, (CHW, D), dtype=jnp.float32) * 0.02   # model linear weight
    bm = jax.random.normal(kbm, (1, D), dtype=jnp.float32) * 0.02     # model linear bias
    Wc = jax.random.normal(kwc, (NC, D), dtype=jnp.float32) * 0.1     # model.weight (classifier)

    loss, acc = jax.jit(softmax_loss)(x, label, Wm, bm, Wc)
    jax.block_until_ready((loss, acc))

    ref_loss, ref_acc, ref_logit = reference(x, label, Wm, bm, Wc)

    # bf16 MXU operands on the CHW matmul -> slightly looser loss tolerance.
    assert abs(float(loss) - float(ref_loss)) < 1.5e-2, (float(loss), float(ref_loss))

    # Accuracy must match exactly unless the reference argmax is a near-tie
    # (bf16 rounding could legitimately flip a tie).
    top2 = jnp.sort(ref_logit, axis=1)[:, -2:]
    margin = float(jnp.min(top2[:, 1] - top2[:, 0]))
    if margin > 1e-2:
        assert abs(float(acc) - float(ref_acc)) < 1e-6, (float(acc), float(ref_acc))

    print("KERNEL_OK")
</pallas_src>

<mosaic_0001>
module attributes {stable_mosaic.version = 11 : i64} {
  func.func @_kernel(%arg0: i32, %arg1: memref<2x1024xf32, #tpu.memory_space<vmem>>, %arg2: memref<1024x32xbf16, #tpu.memory_space<vmem>>, %arg3: memref<1x32xf32, #tpu.memory_space<vmem>>, %arg4: memref<10x32xf32, #tpu.memory_space<vmem>>, %arg5: memref<2x1xi32, #tpu.memory_space<vmem>>, %arg6: memref<1x1xf32, #tpu.memory_space<vmem>>, %arg7: memref<1x1xf32, #tpu.memory_space<vmem>>, %arg8: memref<2x32xf32, #tpu.memory_space<vmem>>) attributes {dimension_semantics = [#tpu.dimension_semantics<arbitrary>], iteration_bounds = array<i64: 1>, scalar_prefetch = 0 : i64, scratch_operands = 1 : i64, tpu.core_type = #tpu.core_type<tc>, window_params = [{transform_indices = @transform_0, window_bounds = array<i64: 2, 1024>}, {transform_indices = @transform_1, window_bounds = array<i64: 1024, 32>}, {pipeline_mode = #tpu.pipeline_mode<synchronous>, transform_indices = @transform_2, window_bounds = array<i64: 1, 32>}, {pipeline_mode = #tpu.pipeline_mode<synchronous>, transform_indices = @transform_3, window_bounds = array<i64: 10, 32>}, {pipeline_mode = #tpu.pipeline_mode<synchronous>, transform_indices = @transform_4, window_bounds = array<i64: 2, 1>}, {pipeline_mode = #tpu.pipeline_mode<synchronous>, transform_indices = @transform_5, window_bounds = array<i64: 1, 1>}, {pipeline_mode = #tpu.pipeline_mode<synchronous>, transform_indices = @transform_6, window_bounds = array<i64: 1, 1>}]} {
    %c0_i32 = arith.constant 0 : i32
    %0 = arith.cmpi eq, %arg0, %c0_i32 : i32
    %1 = arith.extui %0 : i1 to i32
    %c0_i32_0 = arith.constant 0 : i32
    %2 = arith.cmpi ne, %1, %c0_i32_0 : i32
    scf.if %2 {
      %cst_10 = arith.constant 0.000000e+00 : f32
      %13 = vector.broadcast %cst_10 : f32 to vector<2x32xf32>
      %c0_11 = arith.constant 0 : index
      %c0_12 = arith.constant 0 : index
      %14 = vector.load %arg8[%c0_11, %c0_12] : memref<2x32xf32, #tpu.memory_space<vmem>>, vector<2x32xf32>
      tpu.vector_store %arg8[%c0_11, %c0_12], %13 {strides = array<i32>} : memref<2x32xf32, #tpu.memory_space<vmem>>, vector<2x32xf32>,
    } else {
    }
    %c0 = arith.constant 0 : index
    %c0_1 = arith.constant 0 : index
    %3 = vector.load %arg8[%c0, %c0_1] : memref<2x32xf32, #tpu.memory_space<vmem>>, vector<2x32xf32>
    %c0_2 = arith.constant 0 : index
    %c0_3 = arith.constant 0 : index
    %4 = vector.load %arg1[%c0_2, %c0_3] : memref<2x1024xf32, #tpu.memory_space<vmem>>, vector<2x1024xf32>
    %5 = arith.truncf %4 : vector<2x1024xf32> to vector<2x1024xbf16>
    %c0_4 = arith.constant 0 : index
    %c0_5 = arith.constant 0 : index
    %6 = vector.load %arg2[%c0_4, %c0_5] : memref<1024x32xbf16, #tpu.memory_space<vmem>>, vector<1024x32xbf16>
    %cst = arith.constant dense<0.000000e+00> : vector<2x32xf32>
    %7 = tpu.matmul %5, %6, %cst {dimension_numbers = #tpu.dot_dimension_numbers<[1], [0], [0], [1], [0, 0, 1, 1], [], []>} : vector<2x1024xbf16>, vector<1024x32xbf16>, vector<2x32xf32> -> vector<2x32xf32>
    %8 = arith.addf %3, %7 : vector<2x32xf32>
    %c0_6 = arith.constant 0 : index
    %c0_7 = arith.constant 0 : index
    %9 = vector.load %arg8[%c0_6, %c0_7] : memref<2x32xf32, #tpu.memory_space<vmem>>, vector<2x32xf32>
    tpu.vector_store %arg8[%c0_6, %c0_7], %8 {strides = array<i32>} : memref<2x32xf32, #tpu.memory_space<vmem>>, vector<2x32xf32>,
    %c0_i32_8 = arith.constant 0 : i32
    %10 = arith.cmpi eq, %arg0, %c0_i32_8 : i32
    %11 = arith.extui %10 : i1 to i32
    %c0_i32_9 = arith.constant 0 : i32
    %12 = arith.cmpi ne, %11, %c0_i32_9 : i32
    scf.if %12 {
      %c0_10 = arith.constant 0 : index
      %c0_11 = arith.constant 0 : index
      %13 = vector.load %arg8[%c0_10, %c0_11] : memref<2x32xf32, #tpu.memory_space<vmem>>, vector<2x32xf32>
      %c0_12 = arith.constant 0 : index
      %c0_13 = arith.constant 0 : index
      %14 = vector.load %arg3[%c0_12, %c0_13] : memref<1x32xf32, #tpu.memory_space<vmem>>, vector<1x32xf32>
      %15 = vector.broadcast %14 : vector<1x32xf32> to vector<2x32xf32>
      %16 = arith.addf %13, %15 : vector<2x32xf32>
      %c0_14 = arith.constant 0 : index
      %c0_15 = arith.constant 0 : index
      %17 = vector.load %arg4[%c0_14, %c0_15] : memref<10x32xf32, #tpu.memory_space<vmem>>, vector<10x32xf32>
      %18 = arith.mulf %17, %17 : vector<10x32xf32>
      %cst_16 = arith.constant dense<0.000000e+00> : vector<10xf32>
      %19 = vector.multi_reduction <add>, %18, %cst_16 [1] : vector<10x32xf32> to vector<10xf32>
      %20 = vector.shape_cast %19 : vector<10xf32> to vector<10x1xf32>
      %cst_17 = arith.constant 1.000000e-24 : f32
      %21 = vector.broadcast %cst_17 : f32 to vector<10x1xf32>
      %22 = arith.maximumf %20, %21 : vector<10x1xf32>
      %23 = math.rsqrt %22 : vector<10x1xf32>
      %24 = vector.broadcast %23 : vector<10x1xf32> to vector<10x32xf32>
      %25 = arith.mulf %17, %24 : vector<10x32xf32>
      %cst_18 = arith.constant dense<0.000000e+00> : vector<2x10xf32>
      %26 = tpu.matmul %16, %25, %cst_18 {dimension_numbers = #tpu.dot_dimension_numbers<[1], [1], [0], [0], [0, 0, 1, 0], [], []>} : vector<2x32xf32>, vector<10x32xf32>, vector<2x10xf32> -> vector<2x10xf32>
      %27 = tpu.iota {dimensions = array<i32: 1>} : vector<2x10xi32>
      %c0_19 = arith.constant 0 : index
      %c0_20 = arith.constant 0 : index
      %28 = vector.load %arg5[%c0_19, %c0_20] : memref<2x1xi32, #tpu.memory_space<vmem>>, vector<2x1xi32>
      %cst_21 = arith.constant dense<0xFF800000> : vector<2xf32>
      %29 = vector.multi_reduction <maximumf>, %26, %cst_21 [1] : vector<2x10xf32> to vector<2xf32>
      %30 = vector.shape_cast %29 : vector<2xf32> to vector<2x1xf32>
      %31 = vector.broadcast %30 : vector<2x1xf32> to vector<2x10xf32>
      %32 = arith.subf %26, %31 : vector<2x10xf32>
      %33 = math.exp %32 : vector<2x10xf32>
      %cst_22 = arith.constant dense<0.000000e+00> : vector<2xf32>
      %34 = vector.multi_reduction <add>, %33, %cst_22 [1] : vector<2x10xf32> to vector<2xf32>
      %35 = vector.shape_cast %34 : vector<2xf32> to vector<2x1xf32>
      %36 = math.log %35 : vector<2x1xf32>
      %37 = arith.addf %30, %36 : vector<2x1xf32>
      %38 = vector.broadcast %28 : vector<2x1xi32> to vector<2x10xi32>
      %39 = arith.cmpi eq, %27, %38 : vector<2x10xi32>
      %cst_23 = arith.constant 0.000000e+00 : f32
      %40 = vector.broadcast %cst_23 : f32 to vector<2x10xf32>
      %41 = arith.select %39, %26, %40 : vector<2x10xi1>, vector<2x10xf32>
      %cst_24 = arith.constant dense<0.000000e+00> : vector<2xf32>
      %42 = vector.multi_reduction <add>, %41, %cst_24 [1] : vector<2x10xf32> to vector<2xf32>
      %43 = vector.shape_cast %42 : vector<2xf32> to vector<2x1xf32>
      %44 = arith.subf %37, %43 : vector<2x1xf32>
      %cst_25 = arith.constant dense<0.000000e+00> : vector<1xf32>
      %45 = vector.multi_reduction <add>, %44, %cst_25 [0] : vector<2x1xf32> to vector<1xf32>
      %46 = vector.shape_cast %45 : vector<1xf32> to vector<1x1xf32>
      %cst_26 = arith.constant 5.000000e-01 : f32
      %47 = vector.broadcast %cst_26 : f32 to vector<1x1xf32>
      %48 = arith.mulf %46, %47 : vector<1x1xf32>
      %c0_27 = arith.constant 0 : index
      %c0_28 = arith.constant 0 : index
      %49 = vector.load %arg6[%c0_27, %c0_28] : memref<1x1xf32, #tpu.memory_space<vmem>>, vector<1x1xf32>
      tpu.vector_store %arg6[%c0_27, %c0_28], %48 {strides = array<i32>} : memref<1x1xf32, #tpu.memory_space<vmem>>, vector<1x1xf32>,
      %50 = vector.broadcast %30 : vector<2x1xf32> to vector<2x10xf32>
      %51 = arith.cmpf oeq, %26, %50 : vector<2x10xf32>
      %c10_i32 = arith.constant 10 : i32
      %52 = vector.broadcast %c10_i32 : i32 to vector<2x10xi32>
      %53 = arith.select %51, %27, %52 : vector<2x10xi1>, vector<2x10xi32>
      %cst_29 = arith.constant dense<2147483647> : vector<2xi32>
      %54 = vector.multi_reduction <minsi>, %53, %cst_29 [1] : vector<2x10xi32> to vector<2xi32>
      %55 = vector.shape_cast %54 : vector<2xi32> to vector<2x1xi32>
      %56 = arith.cmpi eq, %55, %28 : vector<2x1xi32>
      %57 = arith.extui %56 : vector<2x1xi1> to vector<2x1xi32>
      %58 = arith.sitofp %57 : vector<2x1xi32> to vector<2x1xf32>
      %cst_30 = arith.constant dense<0.000000e+00> : vector<1xf32>
      %59 = vector.multi_reduction <add>, %58, %cst_30 [0] : vector<2x1xf32> to vector<1xf32>
      %60 = vector.shape_cast %59 : vector<1xf32> to vector<1x1xf32>
      %cst_31 = arith.constant 5.000000e-01 : f32
      %61 = vector.broadcast %cst_31 : f32 to vector<1x1xf32>
      %62 = arith.mulf %60, %61 : vector<1x1xf32>
      %c0_32 = arith.constant 0 : index
      %c0_33 = arith.constant 0 : index
      %63 = vector.load %arg7[%c0_32, %c0_33] : memref<1x1xf32, #tpu.memory_space<vmem>>, vector<1x1xf32>
      tpu.vector_store %arg7[%c0_32, %c0_33], %62 {strides = array<i32>} : memref<1x1xf32, #tpu.memory_space<vmem>>, vector<1x1xf32>,
    } else {
    }
    return
  }
  func.func @transform_0(%arg0: i32) -> (i32, i32) {
    %c0_i32 = arith.constant 0 : i32
    %c0_i32_0 = arith.constant 0 : i32
    return %c0_i32, %arg0 : i32, i32
  }
  func.func @transform_1(%arg0: i32) -> (i32, i32) {
    %c0_i32 = arith.constant 0 : i32
    %c0_i32_0 = arith.constant 0 : i32
    return %arg0, %c0_i32 : i32, i32
  }
  func.func @transform_2(%arg0: i32) -> (i32, i32) {
    %c0_i32 = arith.constant 0 : i32
    %c0_i32_0 = arith.constant 0 : i32
    %c0_i32_1 = arith.constant 0 : i32
    return %c0_i32, %c0_i32_0 : i32, i32
  }
  func.func @transform_3(%arg0: i32) -> (i32, i32) {
    %c0_i32 = arith.constant 0 : i32
    %c0_i32_0 = arith.constant 0 : i32
    %c0_i32_1 = arith.constant 0 : i32
    return %c0_i32, %c0_i32_0 : i32, i32
  }
  func.func @transform_4(%arg0: i32) -> (i32, i32) {
    %c0_i32 = arith.constant 0 : i32
    %c0_i32_0 = arith.constant 0 : i32
    %c0_i32_1 = arith.constant 0 : i32
    return %c0_i32, %c0_i32_0 : i32, i32
  }
  func.func @transform_5(%arg0: i32) -> (i32, i32) {
    %c0_i32 = arith.constant 0 : i32
    %c0_i32_0 = arith.constant 0 : i32
    %c0_i32_1 = arith.constant 0 : i32
    return %c0_i32, %c0_i32_0 : i32, i32
  }
  func.func @transform_6(%arg0: i32) -> (i32, i32) {
    %c0_i32 = arith.constant 0 : i32
    %c0_i32_0 = arith.constant 0 : i32
    %c0_i32_1 = arith.constant 0 : i32
    return %c0_i32, %c0_i32_0 : i32, i32
  }
}

</mosaic_0001>

<bundles_post_ra>
// kernel: softmax_loss.1
= control target key start
LH: loop header
LB: loop body
LE: loop exit
PB: predicated region body
PF: predicated region fallthrough
CT: control target
= control target key end

     0   :  { %12 = vsyncpa [#allocation4], 0  ;;  %vm28_vm0 = vcmask 254976   ;;  %v1243_v14 = vmov 0.0   ;;  %s1527_s0 = inlined_call_operand.vmem [shape: f32[2,1024], index: 0, kind: input, shape index: {}]   ;;  %s1528_s1 = inlined_call_operand.vmem [shape: bf16[1024,32], index: 1, kind: input, shape index: {}]   ;;  %s1529_s2 = inlined_call_operand.vmem [shape: f32[1,32], index: 2, kind: input, shape index: {}]   ;;  %s1530_s3 = inlined_call_operand.vmem [shape: f32[10,32], index: 3, kind: input, shape index: {}]   ;;  %s1531_s4 = inlined_call_operand.vmem [shape: s32[2,1], index: 4, kind: input, shape index: {}]   ;;  %s1532_s5 = inlined_call_operand.hbm [shape: f32[1,1], index: 5, kind: output, shape index: {0}]   ;;  %s1533_s6 = inlined_call_operand.hbm [shape: f32[1,1], index: 6, kind: output, shape index: {1}]  }
   0x1   :  { %v1119_v0 = vld [vmem:[%s1528_s1 + $0x38] sm:$0xff]  ;;  %v1118_v4 = vld [vmem:[%s1528_s1 + $0x30] sm:$0xff]  ;;  %v1117_v8 = vld [vmem:[%s1528_s1 + $0x28] sm:$0xff]  ;;  %29 = vst.msk [vmem:[#allocation2] sm:$0x3] %vm28_vm0, %v1243_v14 }
   0x2   :  { %v1127_v1 = vld [vmem:[%s1528_s1 + $0x78] sm:$0xff]  ;;  %574 = vmatpush.bf16.msra.mxu0 %v1119_v0  ;;  %v1126_v5 = vld [vmem:[%s1528_s1 + $0x70] sm:$0xff]  ;;  %v1125_v9 = vld [vmem:[%s1528_s1 + $0x68] sm:$0xff] }
   0x3   :  { %v1135_v2 = vld [vmem:[%s1528_s1 + $0xb8] sm:$0xff]  ;;  %587 = vmatpush.bf16.msra.mxu1 %v1127_v1  ;;  %v1134_v6 = vld [vmem:[%s1528_s1 + $0xb0] sm:$0xff]  ;;  %v1133_v10 = vld [vmem:[%s1528_s1 + $0xa8] sm:$0xff] }
   0x4   :  { %v1143_v3 = vld [vmem:[%s1528_s1 + $0xf8] sm:$0xff]  ;;  %600 = vmatpush.bf16.msra.mxu2 %v1135_v2  ;;  %v1142_v7 = vld [vmem:[%s1528_s1 + $0xf0] sm:$0xff]  ;;  %v1141_v11 = vld [vmem:[%s1528_s1 + $0xe8] sm:$0xff] }
   0x5   :  { %613 = vmatpush.bf16.msra.mxu3 %v1143_v3  ;;  %v1116_v12 = vld [vmem:[%s1528_s1 + $0x20] sm:$0xff]  ;;  %v1115_v18 = vld [vmem:[%s1528_s1 + $0x18] sm:$0xff]  ;;  %v1350_v22 = vld [vmem:[%s1530_s3 + $0x8] sm:$0x3] }
   0x6   :  { %575 = vmatpush.bf16.msra.mxu0 %v1118_v4  ;;  %v1124_v13 = vld [vmem:[%s1528_s1 + $0x60] sm:$0xff]  ;;  %v1123_v19 = vld [vmem:[%s1528_s1 + $0x58] sm:$0xff]  ;;  %v693_v23 = vmul.f32 %v1350_v22, %v1350_v22  ;;  %v1114_v24 = vld [vmem:[%s1528_s1 + $0x10] sm:$0xff] }
   0x7   :  { %588 = vmatpush.bf16.msra.mxu1 %v1126_v5  ;;  %v1132_v15 = vld [vmem:[%s1528_s1 + $0xa0] sm:$0xff]  ;;  %v1131_v20 = vld [vmem:[%s1528_s1 + $0x98] sm:$0xff]  ;;  %v1122_v25 = vld [vmem:[%s1528_s1 + $0x50] sm:$0xff] }
   0x8   :  { %601 = vmatpush.bf16.msra.mxu2 %v1134_v6  ;;  %v1140_v16 = vld [vmem:[%s1528_s1 + $0xe0] sm:$0xff]  ;;  %v1139_v21 = vld [vmem:[%s1528_s1 + $0xd8] sm:$0xff]  ;;  %v698_v26 = vsel %vm28_vm0, %v693_v23, 0.0  ;;  %v1130_v28 = vld [vmem:[%s1528_s1 + $0x90] sm:$0xff] }
   0x9   :  { %614 = vmatpush.bf16.msra.mxu3 %v1142_v7  ;;  %v31_v17 = vld [vmem:[%s1527_s0] sm:$0xff]  ;;  %v1138_v29 = vld [vmem:[%s1528_s1 + $0xd0] sm:$0xff]  ;;  %699 = vadd.xlane.f32.xlu0 %v698_v26 }
   0xa   :  { %576 = vmatpush.bf16.msra.mxu0 %v1117_v8  ;;  %35 = vst [vmem:[#allocation1] ss:$4 sm:$0xff] %v31_v17  ;;  %v1364_v27 = vld [vmem:[%s1530_s3] sm:$0xff] }
   0xb   :  { %589 = vmatpush.bf16.msra.mxu1 %v1125_v9 }
   0xc   :  { %602 = vmatpush.bf16.msra.mxu2 %v1133_v10 }
   0xd   :  { %615 = vmatpush.bf16.msra.mxu3 %v1141_v11 }
   0xe   :  { %577 = vmatpush.bf16.msra.mxu0 %v1116_v12 }
   0xf   :  { %590 = vmatpush.bf16.msra.mxu1 %v1124_v13 }
  0x10   :  { %603 = vmatpush.bf16.msra.mxu2 %v1132_v15 }
  0x11   :  { %616 = vmatpush.bf16.msra.mxu3 %v1140_v16 }
  0x12   :  { %578 = vmatpush.bf16.msra.mxu0 %v1115_v18 }
  0x13   :  { %591 = vmatpush.bf16.msra.mxu1 %v1123_v19 }
  0x14   :  { %604 = vmatpush.bf16.msra.mxu2 %v1131_v20 }
  0x15   :  { %617 = vmatpush.bf16.msra.mxu3 %v1139_v21 }
  0x16   :  { %13 = vsyncpa [#allocation6], 0  ;;  %v692_v30 = vmul.f32 %v1364_v27, %v1364_v27  ;;  %579 = vmatpush.bf16.msra.mxu0 %v1114_v24  ;;  %v1113_v31 = vld [vmem:[%s1528_s1 + $0x8] sm:$0xff]  ;;  %vm694_vm1 = vcmask 261120   ;;  %v1112_v36 = vld [vmem:[%s1528_s1] sm:$0xff]  ;;  %vm757_vm8 = vcmask 74752  }
  0x17   :  { %592 = vmatpush.bf16.msra.mxu1 %v1122_v25  ;;  %v1121_v32 = vld [vmem:[%s1528_s1 + $0x48] sm:$0xff]  ;;  %v1120_v37 = vld [vmem:[%s1528_s1 + $0x40] sm:$0xff]  ;;  %v1151_v41 = vld [vmem:[%s1528_s1 + $0x138] sm:$0xff]  ;;  %vm779_vm12 = vcmask 1041408   ;;  %s827_s11 = sshll.u32 %s1532_s5, 4  ;;  %vm788_vm13 = vcmask 0   ;;  %s828_s11 = int_to_ptr.hbm [resolvable:$true] %s827_s11 }
  0x18   :  { %605 = vmatpush.bf16.msra.mxu2 %v1130_v28  ;;  %v1129_v33 = vld [vmem:[%s1528_s1 + $0x88] sm:$0xff]  ;;  %v1128_v38 = vld [vmem:[%s1528_s1 + $0x80] sm:$0xff]  ;;  %v695_v39 = vsel %vm694_vm1, %v692_v30, 0.0  ;;  %v1159_v42 = vld [vmem:[%s1528_s1 + $0x178] sm:$0xff]  ;;  %vm810_vm14 = vcmask 1024   ;;  %s1246_s5 = smov [#allocation5]  }
  0x19   :  { %618 = vmatpush.bf16.msra.mxu3 %v1138_v29  ;;  %v1137_v34 = vld [vmem:[%s1528_s1 + $0xc8] sm:$0xff]  ;;  %v1136_v40 = vld [vmem:[%s1528_s1 + $0xc0] sm:$0xff]  ;;  %v40_v43 = vld.sshfl [vmem:[#allocation1 + $0x10] sm:$0xff pattern:$0x73625140]  ;;  %696 = vadd.xlane.f32.xlu0 %v695_v39  ;;  %s836_s12 = sshll.u32 %s1246_s5, 4  ;;  %s837_s12 = int_to_ptr.vmem [resolvable:$true] %s836_s12 }
  0x1a   :  { %v32_v35 = vld [vmem:[%s1527_s0 + $0x8] sm:$0xff]  ;;  %580 = vmatpush.bf16.msra.mxu0 %v1113_v31  ;;  %v38_v44 = vld.sshfl [vmem:[#allocation1] sm:$0xff pattern:$0x73625140]  ;;  %v1167_v47 = vld [vmem:[%s1528_s1 + $0x1b8] sm:$0xff]  ;;  %v56_v49 = vpack.c.bf16 %v40_v43, %v40_v43  ;;  %s838_s15 = sshll.u32 %s1533_s6, 4  ;;  %s839_s15 = int_to_ptr.hbm [resolvable:$true] %s838_s15 }
  0x1b   :  { %37 = vst [vmem:[#allocation1 + $0x20] ss:$4 sm:$0xff] %v32_v35  ;;  %593 = vmatpush.bf16.msra.mxu1 %v1121_v32  ;;  %v41_v45 = vld.sshfl [vmem:[#allocation1 + $0x18] sm:$0xff pattern:$0x73625140]  ;;  %v54_v50 = vpack.c.bf16 %v38_v44, %v38_v44  ;;  %v1150_v53 = vld [vmem:[%s1528_s1 + $0x130] sm:$0xff] }
  0x1c   :  { %606 = vmatpush.bf16.msra.mxu2 %v1129_v33  ;;  %v39_v46 = vld.sshfl [vmem:[#allocation1 + $0x8] sm:$0xff pattern:$0x73625140]  ;;  %v1175_v48 = vld [vmem:[%s1528_s1 + $0x1f8] sm:$0xff]  ;;  %v57_v51 = vpack.c.bf16 %v41_v45, %v41_v45  ;;  %v1158_v54 = vld [vmem:[%s1528_s1 + $0x170] sm:$0xff] }
  0x1d   :  { %619 = vmatpush.bf16.msra.mxu3 %v1137_v34  ;;  %v55_v52 = vpack.c.bf16 %v39_v46, %v39_v46  ;;  %v1166_v55 = vld [vmem:[%s1528_s1 + $0x1b0] sm:$0xff]  ;;  %v1149_v57 = vld [vmem:[%s1528_s1 + $0x128] sm:$0xff]  ;;  %v1148_v61 = vld [vmem:[%s1528_s1 + $0x120] sm:$0xff] }
  0x1e   :  { %581 = vmatpush.bf16.msra.mxu0 %v1112_v36  ;;  %v1174_v56 = vld [vmem:[%s1528_s1 + $0x1f0] sm:$0xff]  ;;  %v1157_v58 = vld [vmem:[%s1528_s1 + $0x168] sm:$0xff]  ;;  %v1156_v62 = vld [vmem:[%s1528_s1 + $0x160] sm:$0xff] }
  0x1f   :  { %594 = vmatpush.bf16.msra.mxu1 %v1120_v37  ;;  %v1165_v59 = vld [vmem:[%s1528_s1 + $0x1a8] sm:$0xff]  ;;  %v1164_v63 = vld [vmem:[%s1528_s1 + $0x1a0] sm:$0xff]  ;;  %v1147_v1 = vld [vmem:[%s1528_s1 + $0x118] sm:$0xff] }
  0x20   :  { %607 = vmatpush.bf16.msra.mxu2 %v1128_v38  ;;  %v1173_v60 = vld [vmem:[%s1528_s1 + $0x1e8] sm:$0xff]  ;;  %v1172_v0 = vld [vmem:[%s1528_s1 + $0x1e0] sm:$0xff]  ;;  %v1155_v2 = vld [vmem:[%s1528_s1 + $0x158] sm:$0xff] }
  0x21   :  { %620 = vmatpush.bf16.msra.mxu3 %v1136_v40  ;;  %582 = vmatmul.bf16.vlgmr.msra.gmra.mxu0 %v54_v50  ;;  %v1163_v3 = vld [vmem:[%s1528_s1 + $0x198] sm:$0xff]  ;;  %v1146_v5 = vld [vmem:[%s1528_s1 + $0x110] sm:$0xff]  ;;  %v1145_v9 = vld [vmem:[%s1528_s1 + $0x108] sm:$0xff] }
  0x22   :  { %626 = vmatpush.bf16.msrb.mxu0 %v1151_v41  ;;  %595 = vmatmul.bf16.vlgmr.msra.gmra.mxu1 %v55_v52  ;;  %v1171_v4 = vld [vmem:[%s1528_s1 + $0x1d8] sm:$0xff]  ;;  %v1154_v6 = vld [vmem:[%s1528_s1 + $0x150] sm:$0xff]  ;;  %v1153_v10 = vld [vmem:[%s1528_s1 + $0x148] sm:$0xff] }
  0x23   :  { %639 = vmatpush.bf16.msrb.mxu1 %v1159_v42  ;;  %608 = vmatmul.bf16.vlgmr.msra.gmra.mxu2 %v56_v49  ;;  %v1162_v7 = vld [vmem:[%s1528_s1 + $0x190] sm:$0xff]  ;;  %v1161_v11 = vld [vmem:[%s1528_s1 + $0x188] sm:$0xff]  ;;  %v1144_v13 = vld [vmem:[%s1528_s1 + $0x100] sm:$0xff] }
  0x24   :  { %652 = vmatpush.bf16.msrb.mxu2 %v1167_v47  ;;  %621 = vmatmul.bf16.vlgmr.msra.gmra.mxu3 %v57_v51  ;;  %v1170_v8 = vld [vmem:[%s1528_s1 + $0x1d0] sm:$0xff]  ;;  %v1169_v12 = vld [vmem:[%s1528_s1 + $0x1c8] sm:$0xff]  ;;  %v1152_v15 = vld [vmem:[%s1528_s1 + $0x140] sm:$0xff] }
  0x25   :  { %665 = vmatpush.bf16.msrb.mxu3 %v1175_v48  ;;  %v1160_v16 = vld [vmem:[%s1528_s1 + $0x180] sm:$0xff]  ;;  %v43_v19 = vld.sshfl [vmem:[#allocation1 + $0x28] sm:$0xff pattern:$0x73625140] }
  0x26   :  { %627 = vmatpush.bf16.msrb.mxu0 %v1150_v53  ;;  %v1168_v17 = vld [vmem:[%s1528_s1 + $0x1c0] sm:$0xff]  ;;  %v44_v20 = vld.sshfl [vmem:[#allocation1 + $0x30] sm:$0xff pattern:$0x73625140]  ;;  %v59_v24 = vpack.c.bf16 %v43_v19, %v43_v19 }
  0x27   :  { %640 = vmatpush.bf16.msrb.mxu1 %v1158_v54  ;;  %v42_v18 = vld.sshfl [vmem:[#allocation1 + $0x20] sm:$0xff pattern:$0x73625140]  ;;  %v45_v21 = vld.sshfl [vmem:[#allocation1 + $0x38] sm:$0xff pattern:$0x73625140]  ;;  %v60_v25 = vpack.c.bf16 %v44_v20, %v44_v20 }
  0x28   :  { %653 = vmatpush.bf16.msrb.mxu2 %v1166_v55  ;;  %v58_v23 = vpack.c.bf16 %v42_v18, %v42_v18  ;;  %v61_v26 = vpack.c.bf16 %v45_v21, %v45_v21 }
  0x29   :  { %666 = vmatpush.bf16.msrb.mxu3 %v1174_v56  ;;  %v1505_v56 = vld [vmem:[%s1531_s4] sm:$0x3] }
  0x2a   :  { %628 = vmatpush.bf16.msrb.mxu0 %v1149_v57  ;;  %v1244_v57 = vmov 0  }
  0x2b   :  { %641 = vmatpush.bf16.msrb.mxu1 %v1157_v58  ;;  %1180 = vset.pattern.permute.xlu2 %v1244_v57 }
  0x2c   :  { %654 = vmatpush.bf16.msrb.mxu2 %v1165_v59  ;;  %1181 = vset.pattern.permute.xlu0 %v1244_v57 }
  0x2d   :  { %667 = vmatpush.bf16.msrb.mxu3 %v1173_v60  ;;  %771 = vperm.xlu2 %1180, %v1505_v56  }
  0x2e   :  { %629 = vmatpush.bf16.msrb.mxu0 %v1148_v61 }
  0x2f   :  { %642 = vmatpush.bf16.msrb.mxu1 %v1156_v62 }
  0x30   :  { %655 = vmatpush.bf16.msrb.mxu2 %v1164_v63 }
  0x31   :  { %668 = vmatpush.bf16.msrb.mxu3 %v1172_v0 }
  0x32   :  { %630 = vmatpush.bf16.msrb.mxu0 %v1147_v1 }
  0x33   :  { %643 = vmatpush.bf16.msrb.mxu1 %v1155_v2 }
  0x34   :  { %656 = vmatpush.bf16.msrb.mxu2 %v1163_v3 }
  0x35   :  { %669 = vmatpush.bf16.msrb.mxu3 %v1171_v4  ;;  %v30_v4 = vld [vmem:[#allocation2] sm:$0x3] }
  0x36   :  { %631 = vmatpush.bf16.msrb.mxu0 %v1146_v5 }
  0x37   :  { %644 = vmatpush.bf16.msrb.mxu1 %v1154_v6 }
  0x38   :  { %657 = vmatpush.bf16.msrb.mxu2 %v1162_v7 }
  0x39   :  { %670 = vmatpush.bf16.msrb.mxu3 %v1170_v8 }
  0x3a   :  { %632 = vmatpush.bf16.msrb.mxu0 %v1145_v9  ;;  %v1182_v9 = vld [vmem:[%s1529_s2] ss:$0 sm:$0xff]  ;;  %s1245_s2 = smov [#allocation3]  }
  0x3b   :  { %645 = vmatpush.bf16.msrb.mxu1 %v1153_v10  ;;  %s825_s8 = sshll.u32 %s1245_s2, 4  ;;  %s826_s8 = int_to_ptr.vmem [resolvable:$true] %s825_s8 }
  0x3c   :  { %658 = vmatpush.bf16.msrb.mxu2 %v1161_v11 }
  0x3d   :  { %671 = vmatpush.bf16.msrb.mxu3 %v1169_v12 }
  0x3e   :  { %633 = vmatpush.bf16.msrb.mxu0 %v1144_v13 }
  0x3f   :  { %646 = vmatpush.bf16.msrb.mxu1 %v1152_v15  ;;  %v754_v15 = vlaneseq }
  0x40   :  { %659 = vmatpush.bf16.msrb.mxu2 %v1160_v16 }
  0x41   :  { %672 = vmatpush.bf16.msrb.mxu3 %v1168_v17  ;;  %634 = vmatmul.bf16.vlgmr.msrb.gmra.mxu0 %v58_v23  ;;  %v755_v16 = vand.u32 127, %v754_v15 }
  0x42   :  { %647 = vmatmul.bf16.vlgmr.msrb.gmra.mxu1 %v59_v24 }
  0x43   :  { %660 = vmatmul.bf16.vlgmr.msrb.gmra.mxu2 %v60_v25 }
  0x44   :  { %673 = vmatmul.bf16.vlgmr.msrb.gmra.mxu3 %v61_v26 }
  0x7c   :  { %v700_v28 = vpop.xlane.xlu0 %699 }
  0x7d   :  { %v702_v29 = vmax.f32 %v700_v28, 1e-24 }
  0x7f   :  { %1183 = vrsqrt.f32 %v702_v29  ;;  %vm719_vm2 = vweird.f32 %v702_v29 }
  0x85   :  { %v1184_v31 = vpop.eup %1183 }
  0x86   :  { %v714_v33 = vmul.f32 %v1184_v31, %v702_v29  ;;  %vm720_vm3 = vweird.f32 %v1184_v31 }
  0x87   :  { %vm721_vm4 = vmor %vm719_vm2, %vm720_vm3  ;;  %v772_v24 = vpop.permute.xlu2 %771 }
  0x88   :  { %v715_v34 = vmul.f32 %v1184_v31, %v714_v33  ;;  %vm773_vm10 = vcmp.eq.s32.totalorder %v755_v16, %v772_v24 }
  0x8a   :  { %v716_v35 = vmul.f32 0.5, %v715_v34 }
  0x8c   :  { %v697_v30 = vpop.xlane.xlu0 %696  ;;  %v717_v36 = vsub.f32 1.5, %v716_v35 }
  0x8d   :  { %v701_v32 = vmax.f32 %v697_v30, 1e-24 }
  0x8e   :  { %v718_v38 = vmul.f32 %v1184_v31, %v717_v36 }
  0x8f   :  { %1185 = vrsqrt.f32 %v701_v32  ;;  %vm709_vm5 = vweird.f32 %v701_v32 }
  0x90   :  { %v722_v40 = vsel %vm721_vm4, %v1184_v31, %v718_v38 }
  0x91   :  { %v724_v42 = vmul.f32 %v722_v40, %v1350_v22 }
  0x93   :  { %1108 = vmatpush.xpose.msk.msra.mxu0 %vm694_vm1, %v724_v42 }
  0x95   :  { %v1186_v37 = vpop.eup %1185 }
  0x96   :  { %v704_v39 = vmul.f32 %v1186_v37, %v701_v32  ;;  %vm710_vm6 = vweird.f32 %v1186_v37 }
  0x97   :  { %vm711_vm7 = vmor %vm709_vm5, %vm710_vm6 }
  0x98   :  { %v705_v41 = vmul.f32 %v1186_v37, %v704_v39 }
  0x9a   :  { %v706_v43 = vmul.f32 0.5, %v705_v41 }
  0x9c   :  { %v707_v44 = vsub.f32 1.5, %v706_v43 }
  0x9e   :  { %v583_v45 = vpop.f32.mrf.mxu0  ;;  %v708_v47 = vmul.f32 %v1186_v37, %v707_v44 }
  0x9f   :  { %v596_v46 = vpop.f32.mrf.mxu1 }
  0xa0   :  { %v712_v48 = vsel %vm711_vm7, %v1186_v37, %v708_v47  ;;  %v597_v55 = vadd.f32 %v596_v46, %v583_v45 }
  0xa1   :  { %v723_v49 = vmul.f32 %v712_v48, %v1364_v27 }
  0xa3   :  { %1109 = vmatpush.xpose.msk.msra.mxu0 %vm694_vm1, %v723_v49 }
  0xa6   :  { %v609_v50 = vpop.f32.mrf.mxu2  ;;  %v585_v52 = vpop.f32.mrf.mxu0 }
  0xa7   :  { %v622_v51 = vpop.f32.mrf.mxu3  ;;  %v598_v53 = vpop.f32.mrf.mxu1  ;;  %v610_v27 = vadd.f32 %v609_v50, %v597_v55 }
  0xa9   :  { %v623_v58 = vadd.f32 %v622_v51, %v610_v27 }
  0xae   :  { %v611_v22 = vpop.f32.mrf.mxu2 }
  0xaf   :  { %v624_v54 = vpop.f32.mrf.mxu3 }
  0xbe   :  { %v635_v59 = vpop.f32.mrf.mxu0 }
  0xbf   :  { %v648_v60 = vpop.f32.mrf.mxu1  ;;  %v636_v61 = vadd.f32 %v635_v59, %v623_v58 }
  0xc1   :  { %v649_v62 = vadd.f32 %v648_v60, %v636_v61 }
  0xc6   :  { %v661_v63 = vpop.f32.mrf.mxu2  ;;  %v637_v2 = vpop.f32.mrf.mxu0 }
  0xc7   :  { %v674_v0 = vpop.f32.mrf.mxu3  ;;  %v662_v1 = vadd.f32 %v661_v63, %v649_v62  ;;  %v650_v3 = vpop.f32.mrf.mxu1 }
  0xc9   :  { %v675_v5 = vadd.f32 %v674_v0, %v662_v1 }
  0xcb   :  { %v678_v6 = vadd.f32 %v675_v5, %v30_v4 }
  0xcd   :  { %680 = vst.msk [vmem:[#allocation2] sm:$0x3] %vm28_vm0, %v678_v6 }
  0xce   :  { %v663_v7 = vpop.f32.mrf.mxu2 }
  0xcf   :  { %v676_v8 = vpop.f32.mrf.mxu3 }
  0xd4   :  { %v684_v10 = vld [vmem:[#allocation2] sm:$0x3] }
  0xd5   :  { %v689_v11 = vadd.f32 %v1182_v9, %v684_v10 }
  0xd7   :  { %1110 = vmatmul.msk.f32.vlgmr.msra.gmra.mxu0 %vm694_vm1, %v689_v11 }
 0x154   :  { %v751_v12 = vpop.f32.mrf.mxu0 }
 0x155   :  { %v758_v13 = vsel %vm757_vm8, %v751_v12, -inf  ;;  %v774_v29 = vsel %vm773_vm10, %v751_v12, 0.0 }
 0x156   :  { %759 = vmax.xlane.f32.xlu1 %v758_v13  ;;  %v775_v30 = vsel %vm757_vm8, %v774_v29, 0.0 }
 0x1c9   :  { %v760_v17 = vpop.xlane.xlu1 %759 }
 0x1ca   :  { %v761_v18 = vsub.f32 %v751_v12, %v760_v17  ;;  %vm790_vm9 = vcmp.eq.f32.partialorder %v751_v12, %v760_v17 }
 0x1cb   :  { %v791_v19 = vsel %vm790_vm9, %v755_v16, 10 }
 0x1cc   :  { %v762_v20 = vmul.f32 1.442695, %v761_v18  ;;  %v792_v21 = vsel %vm757_vm8, %v791_v19, 2147483647 }
 0x1cd   :  { %v794_v23 = vshra.s32 %v792_v21, 16  ;;  %v793_v31 = vand.u32 65535, %v792_v21 }
 0x1ce   :  { %1187 = vpow2.f32 %v762_v20 }
 0x1cf   :  { %v796_v25 = vcvt.s32.f32 %v794_v23  ;;  %v795_v33 = vcvt.s32.f32 %v793_v31 }
 0x1d1   :  { %797 = vmin.xlane.f32.xlu1 %v796_v25 }
 0x1d4   :  { %v1188_v26 = vpop.eup %1187 }
 0x1d5   :  { %v764_v28 = vsel %vm757_vm8, %v1188_v26, 0.0 }
 0x1d6   :  { %765 = vadd.xlane.f32.xlu2 %v764_v28 }
 0x1d9   :  { %776 = vadd.xlane.f32.xlu1 %v775_v30 }
 0x244   :  { %v798_v32 = vpop.xlane.xlu1 %797 }
 0x245   :  { %vm799_vm11 = vcmp.eq.f32.partialorder %v796_v25, %v798_v32  ;;  %v804_v49 = vcvt.f32.s32 %v798_v32 }
 0x246   :  { %v800_v34 = vsel %vm799_vm11, %v795_v33, inf }
 0x247   :  { %801 = vmin.xlane.f32.xlu0 %v800_v34  ;;  %v805_v51 = vshll.u32 %v804_v49, 16 }
 0x249   :  { %v766_v35 = vpop.xlane.xlu2 %765 }
 0x24a   :  { %1189 = vlog2.f32 %v766_v35 }
 0x24c   :  { %v777_v39 = vpop.xlane.xlu1 %776 }
 0x250   :  { %v1190_v36 = vpop.eup %1189 }
 0x251   :  { %v768_v37 = vmul.f32 0.6931472, %v1190_v36 }
 0x253   :  { %v769_v38 = vadd.f32 %v768_v37, %v760_v17 }
 0x255   :  { %v778_v40 = vsub.f32 %v769_v38, %v777_v39 }
 0x257   :  { %v780_v41 = vsel %vm779_vm12, %v778_v40, 0.0 }
 0x258   :  { %v781_v42 = vrot.slane %v780_v41, 4 }
 0x25a   :  { %v782_v43 = vadd.f32 %v781_v42, %v780_v41 }
 0x25c   :  { %v783_v44 = vrot.slane %v782_v43, 2 }
 0x25e   :  { %v784_v45 = vadd.f32 %v783_v44, %v782_v43 }
 0x260   :  { %v785_v46 = vrot.slane %v784_v45, 1 }
 0x262   :  { %v786_v47 = vadd.f32 %v785_v46, %v784_v45 }
 0x264   :  { %v787_v48 = vmul.f32 0.5, %v786_v47 }
 0x266   :  { %789 = vst.msk [vmem:[#allocation3] sm:$0x1] %vm788_vm13, %v787_v48 }
 0x267   :  { %830 = dma.vmem_to_hbm [thread:$0]  %s826_s8, 16, %s828_s11, [#allocation4]  }
 0x2ba   :  { %v802_v50 = vpop.xlane.xlu0 %801 }
 0x2bb   :  { %v803_v52 = vcvt.f32.s32 %v802_v50 }
 0x2bd   :  { %v806_v53 = vadd.s32 %v805_v51, %v803_v52 }
 0x2bf   :  { %vm807_vm15 = vcmp.eq.s32.totalorder %v806_v53, %v1505_v56 }
 0x2c0   :  { %v1111_v22 = vsel %vm807_vm15, 1.0, %v1243_v14 }
 0x2c1   :  { %v811_v54 = vsel %vm810_vm14, %v1111_v22, 0.0 }
 0x2c2   :  { %v812_v55 = vrot.slane %v811_v54, 4 }
 0x2c4   :  { %v813_v57 = vadd.f32 %v812_v55, %v811_v54 }
 0x2c6   :  { %v814_v27 = vrot.slane %v813_v57, 2 }
 0x2c8   :  { %v815_v58 = vadd.f32 %v814_v27, %v813_v57 }
 0x2ca   :  { %v816_v59 = vrot.slane %v815_v58, 1 }
 0x2cc   :  { %v817_v60 = vadd.f32 %v816_v59, %v815_v58 }
 0x2ce   :  { %v818_v61 = vmul.f32 0.5, %v817_v60 }
 0x2d0   :  { %819 = vst.msk [vmem:[#allocation5] sm:$0x1] %vm788_vm13, %v818_v61 }
 0x2d1   :  { %841 = dma.vmem_to_hbm [thread:$0]  %s837_s12, 16, %s839_s15, [#allocation6]  }
 0x2d2   :  { %1239 = dma.done.wait [#allocation4], 16  }
 0x2d3   :  { %1240 = vsyncadd [#allocation4], 4294967280 }
 0x2d4   :  { %1241 = dma.done.wait [#allocation6], 16  }
 0x2d5   :  { %1242 = vsyncadd [#allocation6], 4294967280 }
 0x2d6   :  { %850 = vsyncpa [#allocation4], 1 }
 0x2d7   :  { %851 = vsyncpa [#allocation6], 1 }

</bundles_post_ra>
